<compile_context>
chip_gen: v7x
topology: tpu7x:2x2x1
jax: 0.10.0
libtpu: 0.0.40
codegen_flags: <defaults>
</compile_context>

<pallas_src>
import jax
import jax.numpy as jnp
from jax.experimental import pallas as pl
from jax.experimental.pallas import tpu as pltpu

IN_FEATURES = 784
HIDDEN = 256
HALF = HIDDEN // 2          # 128 — one lane group, used for the layer-2 pre-fold
NEG_SLOPE = 0.01            # PyTorch nn.LeakyReLU default negative_slope

MAX_TILE_B = 4096           # tile upper bound (working set stays well under 64 MiB VMEM)
MIN_TILE_B = 512            # tile lower bound once tiling kicks in (amortize ~0.35 us/step)
TARGET_STEPS = 8            # aim for >= 8 grid steps on big batches (v7x megacore + overlap)


def _round_up(n, m):
    return ((n + m - 1) // m) * m


def _discriminator_kernel(x_ref, w1_ref, b1_ref, w2_ref, b2_ref, o_ref):
    # x_ref : [TB, 784]   f32 or bf16 (batch tile, pipelined)
    # w1_ref: [784, 256]  bf16        (VMEM-resident: constant index_map)
    # b1_ref: [1, 256]    f32
    # w2_ref: [1, 256]    f32         (second-layer weight as a row)
    # b2_ref: [1, 1]      f32
    # o_ref : [TB, 1]     f32
    x_bf = x_ref[...].astype(jnp.bfloat16)          # in-kernel cast, hidden under the x DMA
    h = jnp.dot(x_bf, w1_ref[...], preferred_element_type=jnp.float32)
    h = h + b1_ref[...]
    h = jnp.maximum(h, NEG_SLOPE * h)               # LeakyReLU (0 < slope < 1)
    # Layer 2 (N=1): keep it off the MXU. VPU multiply, pre-fold 256 -> 128 lanes on the
    # VPU, then a single 128-lane XLU reduce (halves the cross-lane work).
    hw = h * w2_ref[...]
    z = jnp.sum(hw[:, :HALF] + hw[:, HALF:], axis=-1, keepdims=True) + b2_ref[...]
    o_ref[...] = 1.0 / (1.0 + jnp.exp(-z))          # sigmoid: exp lands on the EUP slot


def _choose_tile_b(B, tile_b=None):
    if tile_b is not None:
        return min(_round_up(max(tile_b, 8), 8), MAX_TILE_B)
    b8 = _round_up(B, 8)
    if b8 <= MIN_TILE_B:
        return b8                                    # tiny batch: single tile
    tb = _round_up(pl.cdiv(B, TARGET_STEPS), 8)      # >= TARGET_STEPS grid steps
    return max(MIN_TILE_B, min(tb, MAX_TILE_B))


def discriminator_forward(x, w1_t, b1, w2_t, b2, *, tile_b=None):
    """x: [B,784] f32 or bf16; w1_t: [784,256]; b1: [256]/[1,256]; w2_t: [256,1]; b2: [1]/[1,1]."""
    B, K = x.shape
    assert K == IN_FEATURES

    tb = _choose_tile_b(B, tile_b)
    grid = (pl.cdiv(B, tb),)                         # ragged last block handled by Pallas

    # Weights/biases are tiny and VMEM-resident: cast/reshape once per call on the host.
    # x itself is streamed unpadded (no host-side pad or cast).
    w1_bf = jnp.asarray(w1_t).astype(jnp.bfloat16)               # [784, 256]
    b1_r = jnp.asarray(b1, jnp.float32).reshape(1, HIDDEN)       # [1, 256]
    w2_r = jnp.asarray(w2_t, jnp.float32).reshape(1, HIDDEN)     # [256,1] -> row
    b2_r = jnp.asarray(b2, jnp.float32).reshape(1, 1)            # [1, 1]

    # VMEM budget (double-buffered x + resident bf16 w1 + f32 intermediates), capped by
    # the physical VMEM of the current chip (64 MiB/TC on v7x, 128 MiB on v5e/v6e).
    x_item = x.dtype.itemsize
    work = (2 * tb * IN_FEATURES * x_item            # x tiles (double-buffered)
            + 2 * IN_FEATURES * HIDDEN * 2           # w1 bf16 (counted double-buffered)
            + 2 * tb * HIDDEN * 4                    # h / hw f32 intermediates
            + 2 * tb * 4                             # out tiles
            + (2 << 20))                             # biases / w2 / compiler scratch slack
    try:
        vmem_phys = pltpu.get_tpu_info().vmem_capacity_bytes
    except Exception:
        vmem_phys = 64 * 2**20                       # conservative default (v7x per-TC)
    vmem_limit = int(min(int(0.9 * vmem_phys), max(16 * 2**20, work)))

    cost = pl.CostEstimate(
        flops=2 * B * IN_FEATURES * HIDDEN + 4 * B * HIDDEN,
        transcendentals=B,
        bytes_accessed=(B * IN_FEATURES * x_item + w1_bf.size * 2
                        + (b1_r.size + w2_r.size + b2_r.size) * 4 + B * 4),
    )

    out = pl.pallas_call(
        _discriminator_kernel,
        out_shape=jax.ShapeDtypeStruct((B, 1), jnp.float32),
        grid=grid,
        in_specs=[
            pl.BlockSpec((tb, IN_FEATURES), lambda i: (i, 0)),      # x: batch-tiled, K unpadded
            pl.BlockSpec((IN_FEATURES, HIDDEN), lambda i: (0, 0)),  # w1: resident
            pl.BlockSpec((1, HIDDEN), lambda i: (0, 0)),            # b1: resident
            pl.BlockSpec((1, HIDDEN), lambda i: (0, 0)),            # w2 row: resident
            pl.BlockSpec((1, 1), lambda i: (0, 0)),                 # b2: resident
        ],
        out_specs=pl.BlockSpec((tb, 1), lambda i: (i, 0)),
        compiler_params=pltpu.CompilerParams(
            dimension_semantics=("parallel",),                      # megacore sharding on v7x
            vmem_limit_bytes=vmem_limit,
        ),
        cost_estimate=cost,
    )(x, w1_bf, b1_r, w2_r, b2_r)

    return out


def init_params(key):
    """Deterministic init mimicking PyTorch nn.Linear default (uniform(-1/sqrt(fan_in), +))."""
    k1, k2, k3, k4 = jax.random.split(key, 4)
    in1, out1 = IN_FEATURES, HIDDEN
    in2, out2 = HIDDEN, 1
    bound1 = 1.0 / jnp.sqrt(in1)
    bound2 = 1.0 / jnp.sqrt(in2)
    # PyTorch stores weight as [out, in]; build that then transpose for the kernel.
    w1 = jax.random.uniform(k1, (out1, in1), jnp.float32, -bound1, bound1)
    b1 = jax.random.uniform(k2, (out1,), jnp.float32, -bound1, bound1)
    w2 = jax.random.uniform(k3, (out2, in2), jnp.float32, -bound2, bound2)
    b2 = jax.random.uniform(k4, (out2,), jnp.float32, -bound2, bound2)
    return (
        w1.T,                      # [784, 256]
        b1.reshape(1, out1),       # [1, 256]
        w2.T,                      # [256, 1]
        b2.reshape(1, out2),       # [1, 1]
    )


def reference_forward_bf16(x, w1_t, b1, w2_t, b2):
    """Same math as the kernel (bf16 matmul operands, f32 accumulation / epilogue)."""
    h = jnp.dot(x.astype(jnp.bfloat16), jnp.asarray(w1_t).astype(jnp.bfloat16),
                preferred_element_type=jnp.float32) + jnp.asarray(b1, jnp.float32).reshape(1, -1)
    h = jnp.maximum(h, NEG_SLOPE * h)
    z = h @ jnp.asarray(w2_t, jnp.float32).reshape(-1, 1) + jnp.asarray(b2, jnp.float32).reshape(1, 1)
    return 1.0 / (1.0 + jnp.exp(-z))


def reference_forward_f32(x, w1_t, b1, w2_t, b2):
    h = x @ w1_t + jnp.asarray(b1).reshape(1, -1)
    h = jnp.where(h > 0, h, NEG_SLOPE * h)
    z = h @ jnp.asarray(w2_t).reshape(-1, 1) + jnp.asarray(b2).reshape(1, 1)
    return jax.nn.sigmoid(z)


if __name__ == "__main__":
    key = jax.random.PRNGKey(0)
    kx, kp = jax.random.split(key)

    B = 20
    x = jax.random.normal(kx, (B, IN_FEATURES), jnp.float32)
    w1_t, b1, w2_t, b2 = init_params(kp)

    ref_bf16 = reference_forward_bf16(x, w1_t, b1, w2_t, b2)
    ref_f32 = reference_forward_f32(x, w1_t, b1, w2_t, b2)

    # 1) multi-step grid with a ragged last tile (20 rows, tile of 8 -> 3 grid steps)
    out_tiled = jax.block_until_ready(
        discriminator_forward(x, w1_t, b1, w2_t, b2, tile_b=8))
    # 2) default tile-selection path (single small tile)
    out_default = jax.block_until_ready(
        discriminator_forward(x, w1_t, b1, w2_t, b2))

    for out in (out_tiled, out_default):
        assert out.shape == (B, 1), out.shape
        assert bool(jnp.all(jnp.isfinite(out)))
        assert jnp.allclose(out, ref_bf16, atol=2e-3, rtol=2e-3), (out, ref_bf16)
        assert jnp.allclose(out, ref_f32, atol=2e-2, rtol=2e-2), (out, ref_f32)

    print("KERNEL_OK")
</pallas_src>

<mosaic_0001>
module attributes {stable_mosaic.version = 11 : i64} {
  func.func @_discriminator_kernel(%arg0: i32, %arg1: memref<8x784xf32, #tpu.memory_space<vmem>>, %arg2: memref<784x256xbf16, #tpu.memory_space<vmem>>, %arg3: memref<1x256xf32, #tpu.memory_space<vmem>>, %arg4: memref<1x256xf32, #tpu.memory_space<vmem>>, %arg5: memref<1x1xf32, #tpu.memory_space<vmem>>, %arg6: memref<8x1xf32, #tpu.memory_space<vmem>>) attributes {dimension_semantics = [#tpu.dimension_semantics<parallel>], iteration_bounds = array<i64: 3>, scalar_prefetch = 0 : i64, scratch_operands = 0 : i64, tpu.core_type = #tpu.core_type<tc>, window_params = [{transform_indices = @transform_0, window_bounds = array<i64: 8, 784>}, {pipeline_mode = #tpu.pipeline_mode<synchronous>, transform_indices = @transform_1, window_bounds = array<i64: 784, 256>}, {pipeline_mode = #tpu.pipeline_mode<synchronous>, transform_indices = @transform_2, window_bounds = array<i64: 1, 256>}, {pipeline_mode = #tpu.pipeline_mode<synchronous>, transform_indices = @transform_3, window_bounds = array<i64: 1, 256>}, {pipeline_mode = #tpu.pipeline_mode<synchronous>, transform_indices = @transform_4, window_bounds = array<i64: 1, 1>}, {transform_indices = @transform_5, window_bounds = array<i64: 8, 1>}]} {
    %c0 = arith.constant 0 : index
    %c0_0 = arith.constant 0 : index
    %0 = vector.load %arg1[%c0, %c0_0] : memref<8x784xf32, #tpu.memory_space<vmem>>, vector<8x784xf32>
    %1 = arith.truncf %0 : vector<8x784xf32> to vector<8x784xbf16>
    %c0_1 = arith.constant 0 : index
    %c0_2 = arith.constant 0 : index
    %2 = vector.load %arg2[%c0_1, %c0_2] : memref<784x256xbf16, #tpu.memory_space<vmem>>, vector<784x256xbf16>
    %cst = arith.constant dense<0.000000e+00> : vector<8x256xf32>
    %3 = tpu.matmul %1, %2, %cst {dimension_numbers = #tpu.dot_dimension_numbers<[1], [0], [0], [1], [0, 0, 1, 1], [], []>} : vector<8x784xbf16>, vector<784x256xbf16>, vector<8x256xf32> -> vector<8x256xf32>
    %c0_3 = arith.constant 0 : index
    %c0_4 = arith.constant 0 : index
    %4 = vector.load %arg3[%c0_3, %c0_4] : memref<1x256xf32, #tpu.memory_space<vmem>>, vector<1x256xf32>
    %5 = vector.broadcast %4 : vector<1x256xf32> to vector<8x256xf32>
    %6 = arith.addf %3, %5 : vector<8x256xf32>
    %cst_5 = arith.constant 0.00999999977 : f32
    %7 = vector.broadcast %cst_5 : f32 to vector<8x256xf32>
    %8 = arith.mulf %7, %6 : vector<8x256xf32>
    %9 = arith.maximumf %6, %8 : vector<8x256xf32>
    %c0_6 = arith.constant 0 : index
    %c0_7 = arith.constant 0 : index
    %10 = vector.load %arg4[%c0_6, %c0_7] : memref<1x256xf32, #tpu.memory_space<vmem>>, vector<1x256xf32>
    %11 = vector.broadcast %10 : vector<1x256xf32> to vector<8x256xf32>
    %12 = arith.mulf %9, %11 : vector<8x256xf32>
    %13 = vector.extract_strided_slice %12 {offsets = [0, 0], sizes = [8, 128], strides = [1, 1]} : vector<8x256xf32> to vector<8x128xf32>
    %14 = vector.extract_strided_slice %12 {offsets = [0, 128], sizes = [8, 128], strides = [1, 1]} : vector<8x256xf32> to vector<8x128xf32>
    %15 = arith.addf %13, %14 : vector<8x128xf32>
    %cst_8 = arith.constant dense<0.000000e+00> : vector<8xf32>
    %16 = vector.multi_reduction <add>, %15, %cst_8 [1] : vector<8x128xf32> to vector<8xf32>
    %17 = vector.shape_cast %16 : vector<8xf32> to vector<8x1xf32>
    %c0_9 = arith.constant 0 : index
    %c0_10 = arith.constant 0 : index
    %18 = vector.load %arg5[%c0_9, %c0_10] : memref<1x1xf32, #tpu.memory_space<vmem>>, vector<1x1xf32>
    %19 = vector.broadcast %18 : vector<1x1xf32> to vector<8x1xf32>
    %20 = arith.addf %17, %19 : vector<8x1xf32>
    %cst_11 = arith.constant 0.000000e+00 : f32
    %21 = vector.broadcast %cst_11 : f32 to vector<8x1xf32>
    %22 = arith.subf %21, %20 : vector<8x1xf32>
    %23 = math.exp %22 : vector<8x1xf32>
    %cst_12 = arith.constant 1.000000e+00 : f32
    %24 = vector.broadcast %cst_12 : f32 to vector<8x1xf32>
    %25 = arith.addf %24, %23 : vector<8x1xf32>
    %cst_13 = arith.constant 1.000000e+00 : f32
    %26 = vector.broadcast %cst_13 : f32 to vector<8x1xf32>
    %27 = arith.divf %26, %25 : vector<8x1xf32>
    %c0_14 = arith.constant 0 : index
    %c0_15 = arith.constant 0 : index
    %28 = vector.load %arg6[%c0_14, %c0_15] : memref<8x1xf32, #tpu.memory_space<vmem>>, vector<8x1xf32>
    tpu.vector_store %arg6[%c0_14, %c0_15], %27 {strides = array<i32>} : memref<8x1xf32, #tpu.memory_space<vmem>>, vector<8x1xf32>,
    return
  }
  func.func @transform_0(%arg0: i32) -> (i32, i32) {
    %c0_i32 = arith.constant 0 : i32
    %c0_i32_0 = arith.constant 0 : i32
    return %arg0, %c0_i32 : i32, i32
  }
  func.func @transform_1(%arg0: i32) -> (i32, i32) {
    %c0_i32 = arith.constant 0 : i32
    %c0_i32_0 = arith.constant 0 : i32
    %c0_i32_1 = arith.constant 0 : i32
    return %c0_i32, %c0_i32_0 : i32, i32
  }
  func.func @transform_2(%arg0: i32) -> (i32, i32) {
    %c0_i32 = arith.constant 0 : i32
    %c0_i32_0 = arith.constant 0 : i32
    %c0_i32_1 = arith.constant 0 : i32
    return %c0_i32, %c0_i32_0 : i32, i32
  }
  func.func @transform_3(%arg0: i32) -> (i32, i32) {
    %c0_i32 = arith.constant 0 : i32
    %c0_i32_0 = arith.constant 0 : i32
    %c0_i32_1 = arith.constant 0 : i32
    return %c0_i32, %c0_i32_0 : i32, i32
  }
  func.func @transform_4(%arg0: i32) -> (i32, i32) {
    %c0_i32 = arith.constant 0 : i32
    %c0_i32_0 = arith.constant 0 : i32
    %c0_i32_1 = arith.constant 0 : i32
    return %c0_i32, %c0_i32_0 : i32, i32
  }
  func.func @transform_5(%arg0: i32) -> (i32, i32) {
    %c0_i32 = arith.constant 0 : i32
    %c0_i32_0 = arith.constant 0 : i32
    return %arg0, %c0_i32 : i32, i32
  }
}

</mosaic_0001>

<bundles_post_ra>
// kernel: tpu_custom_call.1
= control target key start
LH: loop header
LB: loop body
LE: loop exit
PB: predicated region body
PF: predicated region fallthrough
CT: control target
= control target key end

     0   :  { %s1772_s0 = inlined_call_operand.hbm [shape: f32[20,784], index: 0, kind: input, shape index: {}]   ;;  %s1773_s1 = inlined_call_operand.hbm [shape: bf16[784,256], index: 1, kind: input, shape index: {}]   ;;  %s1774_s2 = inlined_call_operand.vmem [shape: f32[1,256], index: 2, kind: input, shape index: {}]   ;;  %s1775_s3 = inlined_call_operand.vmem [shape: f32[1,256], index: 3, kind: input, shape index: {}]   ;;  %s1776_s4 = inlined_call_operand.<no memory space> [shape: f32[1,1], index: 4, kind: input, shape index: {}]   ;;  %s1777_s5 = inlined_call_operand.vmem [shape: f32[20,1], index: 5, kind: output, shape index: {}]  }
   0x1   :  { %v10_v0 = vstv %s1776_s4 }
   0x2   :  { %11 = vst [vmem:[#allocation2] sm:$0x1] %v10_v0 }
   0x3   :  { %12 = vsyncpa [#allocation4], 0 }
   0x4   :  { %14 = vsyncpa [#allocation4 + $0x1], 0 }
   0x5   :  { %15 = vsyncpa [#allocation6], 0  ;;  %s1618_s20 = smov 0   ;;  %s1620_s21 = smov 0  }
   0x6   :  { %s1622_s22 = smov 0   ;;  %s1624_s23 = smov 0  }
   0x7 LB: > { %s1637_s4 = sadd.s32 4294967295, %s1578_s23   ;;  %p41_p0 = scmp.ne.s32.totalorder %s1570_s21, %s1566_s20  ;;  %s1578_s23 = sphi %s1624_s23, %s1792_s23   ;;  %s1574_s22 = sphi %s1622_s22, %s1791_s22   ;;  %s1570_s21 = sphi %s1620_s21, %s1790_s21   ;;  %s1566_s20 = sphi %s1618_s20, %s1789_s20  }
   0x8   : > { %p1778_p1 = scmp.eq.s32.totalorder %s1637_s4, 0  ;;  %p1154_p2 = scmp.ge.s32.totalorder %s1578_s23, 1 }
   0x9   : > { %p162_p3 = scmp.lt.s32.totalorder %s1578_s23, 4  ;;  %s1580_s26 = smov [#allocation5]  }
   0xa   : > { %p1645_p4 = por %p1778_p1, %p41_p0  ;;  %s174_s27 = sshll.u32 %s1580_s26, 4  ;;  %s175_s27 = int_to_ptr.vmem [resolvable:$true] %s174_s27 }
   0xb   : > { %p1649_p5 = pnand %p1154_p2, %p162_p3  ;;  %s1662_s29 = sadd.s32 1, %s1578_s23  }
   0xc   : > { %s1781_s24 = scalar_select %p1645_p4, 1, 0 }
   0xd   : > { %s1782_s25 = scalar_select %p1649_p5, 1, 0 }
   0xe   : > { %p1284_p6 = pneg %p1649_p5  ;;  %s28_s30 = sadd.s32 1, %s1574_s22 }
   0xf   : > { %s25_s6 = ssub.s32 %s1578_s23, %s1662_s29  ;;  %s1482_s9 = scalar_lea.hbm %s1773_s1, 12544 }
  0x10   : > { %p1657_p7 = pnand %p1284_p6, %p1778_p1  ;;  %p1483_p8 = scmp.ne.s32.totalorder %s1773_s1, %s1482_s9 }
  0x11   : > { %p1489_p12 = scmp.lt.u32.totalorder %s1482_s9, %s1773_s1 }
  0x12   : > { %p1484_p9 = pneg %p1657_p7 }
  0x14   : > { %p1485_p10 = pnand %p1484_p9, %p1483_p8 }
  0x16   : > { %p1486_p11 = pneg %p1485_p10 }
  0x18   : > { %p1491_p13 = pnand %p1489_p12, %p1486_p11 }
  0x1a   : > { %1494 = shalt.err (!%p1491_p13)
}
  0x1b   : > { %s1495_s14 = scalar_lea.vmem %s175_s27, 12544  ;;  %p1503_p6 = scmp.lt.s32.totalorder %s175_s27, %s175_s27 }
  0x1c   : > { %p1496_p0 = scmp.ne.s32.totalorder %s175_s27, %s1495_s14  ;;  %p1504_p1 = scmp.lt.s32.totalorder %s1495_s14, %s1495_s14 }
  0x1e   : > { %p1498_p2 = pnand %p1496_p0, %p1484_p9  ;;  %p1505_p4 = por %p1504_p1, %p1503_p6 }
  0x20   : > { %p1499_p3 = pneg %p1498_p2 }
  0x22   : > { %p1506_p5 = pnand %p1505_p4, %p1499_p3 }
  0x24   : > { %1509 = shalt.err (!%p1506_p5)
}
  0x25   : > { %s1581_s15 = smov 128   ;;  %s1582_s16 = smov 8  }
  0x26   : > { %1287 = dma.hbm_to_vmem [thread:$0]  (!%p1657_p7), %s1773_s1, 12544, %s175_s27, [#allocation6], %s1581_s15, %s1581_s15, %s1582_s16  }
  0x27   : > { %p26_p8 = scmp.eq.s32.totalorder %s25_s6, 0  ;;  %p35_p9 = scmp.ne.s32.totalorder %s1574_s22, %s1570_s21 }
  0x28   : > { %p36_p1 = scmp.eq.s32.totalorder %s1578_s23, 0  ;;  %p1293_p4 = scmp.lt.s32.totalorder %s1578_s23, 3 }
  0x29   : > { %s1688_s19 = scalar_select %p26_p8, %s1574_s22, %s28_s30  }
  0x2a   : > { %p37_p5 = por %p36_p1, %p35_p9  ;;  %s197_s20 = sand.u32 1, %s1574_s22  }
  0x2b   : > { %s1275_s26 = smul.u32 56, %s197_s20  ;;  %s1515_s13 = scalar_lea.hbm %s1772_s0, 2688 }
  0x2c   : > { %s1276_s7 = smul.u32 896, %s1578_s23  ;;  %p1692_p10 = pnand %p1293_p4, %p37_p5 }
  0x2d   : > { %s201_s30 = scalar_lea.vmem [#allocation3], %s1275_s26  ;;  %s198_s23 = scalar_lea.sflag [#allocation4], %s197_s20 }
  0x2e   : > { %s1699_s27 = scalar_lea.hbm %s1772_s0, %s1276_s7  ;;  %s209_s6 = sshll.u32 %s201_s30, 4  ;;  %s1701_s6 = int_to_ptr.vmem [resolvable:$true] %s209_s6 }
  0x2f   : > { %s1510_s10 = scalar_lea.hbm %s1699_s27, 896  ;;  %p1512_p11 = pneg %p1692_p10 }
  0x30   : > { %p1511_p7 = scmp.ne.s32.totalorder %s1699_s27, %s1510_s10  ;;  %p1516_p0 = scmp.lt.u32.totalorder %s1699_s27, %s1772_s0 }
  0x31   : > { %p1517_p2 = scmp.lt.u32.totalorder %s1515_s13, %s1510_s10  ;;  %p1519_p6 = scmp.lt.u32.totalorder %s1510_s10, %s1699_s27 }
  0x32   : > { %p1513_p12 = pnand %p1512_p11, %p1511_p7 }
  0x33   : > { %p1518_p3 = por %p1517_p2, %p1516_p0 }
  0x34   : > { %p1514_p13 = pneg %p1513_p12 }
  0x35   : > { %p1520_p8 = por %p1519_p6, %p1518_p3 }
  0x37   : > { %p1521_p9 = pnand %p1520_p8, %p1514_p13 }
  0x39   : > { %1524 = shalt.err (!%p1521_p9)
}
  0x3a   : > { %s1525_s16 = scalar_lea.vmem %s1701_s6, 896  ;;  %s1583_s17 = smov [#allocation3]  }
  0x3b   : > { %p1526_p1 = scmp.ne.s32.totalorder %s1701_s6, %s1525_s16  ;;  %s1530_s18 = sshll.u32 %s1583_s17, 4  ;;  %s1531_s18 = int_to_ptr.vmem [resolvable:$false] %s1530_s18 }
  0x3c   : > { %s1532_s20 = scalar_lea.vmem %s1531_s18, 1792  ;;  %p1533_p7 = scmp.lt.s32.totalorder %s1701_s6, %s1531_s18 }
  0x3d   : > { %p1528_p4 = pnand %p1526_p1, %p1512_p11  ;;  %p1534_p12 = scmp.lt.s32.totalorder %s1532_s20, %s1525_s16 }
  0x3f   : > { %p1529_p5 = pneg %p1528_p4  ;;  %p1535_p0 = por %p1534_p12, %p1533_p7 }
  0x41   : > { %p1536_p2 = pnand %p1535_p0, %p1529_p5 }
  0x43   : > { %1539 = shalt.err (!%p1536_p2)
}
  0x44   : > { %1291 = dma.hbm_to_vmem [thread:$0]  (!%p1692_p10), %s1699_s27, 896, %s1701_s6, %s198_s23  }
  0x45   : > { %p1785_p13 = scmp.ne.s32.totalorder %s1782_s25, 0 }
  0x46   : > { %s220_s26 = sand.u32 (!%p1785_p13), 1, %s1570_s21   ;;  %p1786_p11 = scmp.ne.s32.totalorder (!%p1785_p13), %s1781_s24, 0 }
  0x47   : > { %218 = sbr.rel (%p1785_p13) target bundleno = 609 (0x261), region = 40  ;;  %s221_s9 = scalar_lea.sflag (!%p1785_p13), [#allocation4], %s220_s26 }
  0x48   : > { %s1277_s7 = smul.u32 (!%p1785_p13), 56, %s220_s26 }
  0x4a   : > { %s1731_s28 = scalar_lea.vmem (!%p1785_p13), [#allocation3], %s1277_s7 }
  0x4e   : > { %1557 = dma.done.wait (%p1786_p11), %s221_s9, 896  }
  0x4f   : > { %1559 = vsyncadd (%p1786_p11), %s221_s9, 4294966400  ;;  %p1787_p3 = scmp.eq.s32.totalorder %s1637_s4, 0 }
  0x51   : > { %1561 = dma.done.wait (%p1787_p3), [#allocation6], 12544   ;;  %p1788_p10 = pmov %p1787_p3 }
  0x52   : > { %v1331_v1 = vld [vmem:[#allocation5 + $0x4] ss:$8 sps:$4 sm:$0xff]   ;;  %v1333_v2 = vld [vmem:[#allocation5] ss:$8 sps:$4 sm:$0xff]   ;;  %v1334_v3 = vld [vmem:[#allocation5 + $0x14] ss:$8 sps:$4 sm:$0xff]  }
  0x53   : > { %1563 = vsyncadd (%p1788_p10), [#allocation6], 4294954752  ;;  %877 = vmatprep.subr.bf16.mxu1 %v1331_v1  ;;  %v1336_v4 = vld [vmem:[#allocation5 + $0x10] ss:$8 sps:$4 sm:$0xff]   ;;  %v1337_v5 = vld [vmem:[#allocation5 + $0x24] ss:$8 sps:$4 sm:$0xff]  }
  0x54   : > { %878 = vmatpush1.bf16.msra.mxu1 %v1333_v2  ;;  %v1339_v6 = vld [vmem:[#allocation5 + $0x20] ss:$8 sps:$4 sm:$0xff]   ;;  %v1340_v7 = vld [vmem:[#allocation5 + $0x34] ss:$8 sps:$4 sm:$0xff]   ;;  %v1342_v8 = vld [vmem:[#allocation5 + $0x30] ss:$8 sps:$4 sm:$0xff]  }
  0x55   : > { %879 = vmatprep.subr.bf16.mxu1 %v1334_v3  ;;  %v1343_v9 = vld [vmem:[#allocation5 + $0x44] ss:$8 sps:$4 sm:$0xff]   ;;  %v1345_v11 = vld [vmem:[#allocation5 + $0x40] ss:$8 sps:$4 sm:$0xff]   ;;  %v1346_v12 = vld [vmem:[#allocation5 + $0x54] ss:$8 sps:$4 sm:$0xff]  }
  0x56   : > { %v1361_v10 = vld [vmem:[#allocation5 + $0x204] ss:$8 sps:$4 sm:$0xff]   ;;  %v1365_v13 = vld [vmem:[#allocation5 + $0x200] ss:$8 sps:$4 sm:$0xff]   ;;  %v1367_v14 = vld [vmem:[#allocation5 + $0x214] ss:$8 sps:$4 sm:$0xff]  }
  0x57   : > { %959 = vmatprep.subr.bf16.mxu0 %v1361_v10  ;;  %v1348_v15 = vld [vmem:[#allocation5 + $0x50] ss:$8 sps:$4 sm:$0xff]   ;;  %v1373_v17 = vld [vmem:[#allocation5 + $0x224] ss:$8 sps:$4 sm:$0xff]   ;;  %v1377_v19 = vld [vmem:[#allocation5 + $0x220] ss:$8 sps:$4 sm:$0xff]  }
  0x58   : > { %880 = vmatpush1.bf16.msra.mxu1 %v1336_v4  ;;  %960 = vmatpush1.bf16.msra.mxu0 %v1365_v13  ;;  %v1371_v16 = vld [vmem:[#allocation5 + $0x210] ss:$8 sps:$4 sm:$0xff]   ;;  %v1349_v18 = vld [vmem:[#allocation5 + $0x64] ss:$8 sps:$4 sm:$0xff]   ;;  %v1379_v20 = vld [vmem:[#allocation5 + $0x234] ss:$8 sps:$4 sm:$0xff]  }
  0x59   : > { %881 = vmatprep.subr.bf16.mxu1 %v1337_v5  ;;  %961 = vmatprep.subr.bf16.mxu0 %v1367_v14  ;;  %v1351_v21 = vld [vmem:[#allocation5 + $0x60] ss:$8 sps:$4 sm:$0xff]   ;;  %v1352_v22 = vld [vmem:[#allocation5 + $0x74] ss:$8 sps:$4 sm:$0xff]   ;;  %v1383_v23 = vld [vmem:[#allocation5 + $0x230] ss:$8 sps:$4 sm:$0xff]  }
  0x5a   : > { %v1385_v24 = vld [vmem:[#allocation5 + $0x244] ss:$8 sps:$4 sm:$0xff]   ;;  %v1354_v25 = vld [vmem:[#allocation5 + $0x70] ss:$8 sps:$4 sm:$0xff]   ;;  %v1389_v27 = vld [vmem:[#allocation5 + $0x240] ss:$8 sps:$4 sm:$0xff]  }
  0x5b   : > { %v1355_v26 = vld [vmem:[#allocation5 + $0x84] ss:$8 sps:$4 sm:$0xff]   ;;  %v1391_v28 = vld [vmem:[#allocation5 + $0x254] ss:$8 sps:$4 sm:$0xff]   ;;  %v1357_v30 = vld [vmem:[#allocation5 + $0x80] ss:$8 sps:$4 sm:$0xff]  }
  0x5c   : > { %882 = vmatpush1.bf16.msra.mxu1 %v1339_v6  ;;  %962 = vmatpush1.bf16.msra.mxu0 %v1371_v16  ;;  %v260_v29 = vld [vmem:[%s1731_s28 + $0x8] sm:$0xff]  ;;  %v1397_v34 = vld [vmem:[#allocation5 + $0x264] ss:$8 sps:$4 sm:$0xff]   ;;  %v1402_v37 = vld [vmem:[#allocation5 + $0x260] ss:$8 sps:$4 sm:$0xff]   ;;  %vm873_vm0 = vcmask 130048  }
  0x5d   : > { %883 = vmatprep.subr.bf16.mxu1 %v1340_v7  ;;  %963 = vmatprep.subr.bf16.mxu0 %v1373_v17  ;;  %v267_v31 = vpack.c.bf16 %v260_v29, %v260_v29  ;;  %v1358_v32 = vld [vmem:[#allocation5 + $0x94] ss:$8 sps:$4 sm:$0xff]   ;;  %v1395_v33 = vld [vmem:[#allocation5 + $0x250] ss:$8 sps:$4 sm:$0xff]   ;;  %v1363_v36 = vld [vmem:[#allocation5 + $0xa4] ss:$8 sps:$4 sm:$0xff]  }
  0x5e   : > { %v1360_v35 = vld [vmem:[#allocation5 + $0x90] ss:$8 sps:$4 sm:$0xff]   ;;  %v1403_v38 = vld [vmem:[#allocation5 + $0x274] ss:$8 sps:$4 sm:$0xff]   ;;  %v1366_v39 = vld [vmem:[#allocation5 + $0xa0] ss:$8 sps:$4 sm:$0xff]  }
  0x5f   : > { %909 = vmatprep.mubr.bf16.mxu1 %v267_v31  ;;  %v1369_v40 = vld [vmem:[#allocation5 + $0xb4] ss:$8 sps:$4 sm:$0xff]   ;;  %v1408_v41 = vld [vmem:[#allocation5 + $0x270] ss:$8 sps:$4 sm:$0xff]   ;;  %v1409_v42 = vld [vmem:[#allocation5 + $0x284] ss:$8 sps:$4 sm:$0xff]  }
  0x60   : > { %884 = vmatpush1.bf16.msra.mxu1 %v1342_v8  ;;  %964 = vmatpush1.bf16.msra.mxu0 %v1377_v19  ;;  %v1372_v43 = vld [vmem:[#allocation5 + $0xb0] ss:$8 sps:$4 sm:$0xff]   ;;  %v1375_v44 = vld [vmem:[#allocation5 + $0xc4] ss:$8 sps:$4 sm:$0xff]   ;;  %v1414_v45 = vld [vmem:[#allocation5 + $0x280] ss:$8 sps:$4 sm:$0xff]  }
  0x61   : > { %885 = vmatprep.subr.bf16.mxu1 %v1343_v9  ;;  %965 = vmatprep.subr.bf16.mxu0 %v1379_v20  ;;  %v1415_v46 = vld [vmem:[#allocation5 + $0x294] ss:$8 sps:$4 sm:$0xff]   ;;  %v1378_v47 = vld [vmem:[#allocation5 + $0xc0] ss:$8 sps:$4 sm:$0xff]   ;;  %v1420_v49 = vld [vmem:[#allocation5 + $0x290] ss:$8 sps:$4 sm:$0xff]  }
  0x62   : > { %v1381_v48 = vld [vmem:[#allocation5 + $0xd4] ss:$8 sps:$4 sm:$0xff]   ;;  %v1421_v50 = vld [vmem:[#allocation5 + $0x2a4] ss:$8 sps:$4 sm:$0xff]   ;;  %v1384_v51 = vld [vmem:[#allocation5 + $0xd0] ss:$8 sps:$4 sm:$0xff]  }
  0x63   : > { %v1387_v52 = vld [vmem:[#allocation5 + $0xe4] ss:$8 sps:$4 sm:$0xff]   ;;  %v1426_v53 = vld [vmem:[#allocation5 + $0x2a0] ss:$8 sps:$4 sm:$0xff]   ;;  %v1427_v54 = vld [vmem:[#allocation5 + $0x2b4] ss:$8 sps:$4 sm:$0xff]  }
  0x64   : > { %886 = vmatpush1.bf16.msra.mxu1 %v1345_v11  ;;  %966 = vmatpush1.bf16.msra.mxu0 %v1383_v23  ;;  %v1390_v55 = vld [vmem:[#allocation5 + $0xe0] ss:$8 sps:$4 sm:$0xff]   ;;  %v1393_v56 = vld [vmem:[#allocation5 + $0xf4] ss:$8 sps:$4 sm:$0xff]   ;;  %v1432_v58 = vld [vmem:[#allocation5 + $0x2b0] ss:$8 sps:$4 sm:$0xff]  }
  0x65   : > { %887 = vmatprep.subr.bf16.mxu1 %v1346_v12  ;;  %967 = vmatprep.subr.bf16.mxu0 %v1385_v24  ;;  %v264_v57 = vld [vmem:[%s1731_s28 + $0x28] sm:$0xff]  ;;  %v1433_v60 = vld [vmem:[#allocation5 + $0x2c4] ss:$8 sps:$4 sm:$0xff]   ;;  %v1438_v0 = vld [vmem:[#allocation5 + $0x2c0] ss:$8 sps:$4 sm:$0xff]   ;;  %v1584_v24 = vmov 0  }
  0x66   : > { %v271_v59 = vpack.c.bf16 %v264_v57, %v264_v57  ;;  %v1396_v61 = vld [vmem:[#allocation5 + $0xf0] ss:$8 sps:$4 sm:$0xff]   ;;  %v1401_v63 = vld [vmem:[#allocation5 + $0x104] ss:$8 sps:$4 sm:$0xff]   ;;  %v1439_v2 = vld [vmem:[#allocation5 + $0x2d4] ss:$8 sps:$4 sm:$0xff]  }
  0x67   : > { %v259_v62 = vld [vmem:[%s1731_s28] sm:$0xff]  ;;  %v262_v8 = vld [vmem:[%s1731_s28 + $0x18] sm:$0xff]  ;;  %p254_p6 = scmp.lt.s32.totalorder %s1637_s4, 2  ;;  %vm1076_vm1 = vcmask 7168  }
  0x68   : > { %888 = vmatpush1.bf16.msra.mxu1 %v1348_v15  ;;  %968 = vmatpush1.bf16.msra.mxu0 %v1389_v27  ;;  %v266_v1 = vpack.c.bf16 %v259_v62, %v259_v62  ;;  %v1399_v3 = vld [vmem:[#allocation5 + $0x100] ss:$8 sps:$4 sm:$0xff]   ;;  %v1407_v4 = vld [vmem:[#allocation5 + $0x114] ss:$8 sps:$4 sm:$0xff]   ;;  %v1444_v5 = vld [vmem:[#allocation5 + $0x2d0] ss:$8 sps:$4 sm:$0xff]   ;;  %v269_v10 = vpack.c.bf16 %v262_v8, %v262_v8 }
  0x69   : > { %889 = vmatprep.subr.bf16.mxu1 %v1349_v18  ;;  %969 = vmatprep.subr.bf16.mxu0 %v1391_v28  ;;  %v1445_v6 = vld [vmem:[#allocation5 + $0x2e4] ss:$8 sps:$4 sm:$0xff]   ;;  %v1405_v7 = vld [vmem:[#allocation5 + $0x110] ss:$8 sps:$4 sm:$0xff]   ;;  %v1450_v11 = vld [vmem:[#allocation5 + $0x2e0] ss:$8 sps:$4 sm:$0xff]  }
  0x6a   : > { %991 = vmatprep.mubr.bf16.mxu0 %v271_v59  ;;  %v1413_v9 = vld [vmem:[#allocation5 + $0x124] ss:$8 sps:$4 sm:$0xff]   ;;  %v1451_v12 = vld [vmem:[#allocation5 + $0x2f4] ss:$8 sps:$4 sm:$0xff]   ;;  %v1411_v13 = vld [vmem:[#allocation5 + $0x120] ss:$8 sps:$4 sm:$0xff]  }
  0x6b   : > { %v1419_v14 = vld [vmem:[#allocation5 + $0x134] ss:$8 sps:$4 sm:$0xff]   ;;  %v1456_v15 = vld [vmem:[#allocation5 + $0x2f0] ss:$8 sps:$4 sm:$0xff]   ;;  %v1465_v17 = vld [vmem:[#allocation5 + $0x304] ss:$8 sps:$4 sm:$0xff]  }
  0x6c   : > { %890 = vmatpush1.bf16.msra.mxu1 %v1351_v21  ;;  %970 = vmatpush1.bf16.msra.mxu0 %v1395_v33  ;;  %v263_v16 = vld [vmem:[%s1731_s28 + $0x20] sm:$0xff]  ;;  %v265_v27 = vld [vmem:[%s1731_s28 + $0x30] sm:$0xff]  ;;  %s1794_s4 = smov (!%p254_p6, %s1637_s4), 2 }
  0x6d   : > { %891 = vmatprep.subr.bf16.mxu1 %v1352_v22  ;;  %971 = vmatprep.subr.bf16.mxu0 %v1397_v34  ;;  %v1417_v18 = vld [vmem:[#allocation5 + $0x130] ss:$8 sps:$4 sm:$0xff]   ;;  %v1425_v19 = vld [vmem:[#allocation5 + $0x144] ss:$8 sps:$4 sm:$0xff]   ;;  %v270_v20 = vpack.c.bf16 %v263_v16, %v263_v16  ;;  %v1463_v21 = vld [vmem:[#allocation5 + $0x300] ss:$8 sps:$4 sm:$0xff]  }
  0x6e   : > { %v1423_v22 = vld [vmem:[#allocation5 + $0x140] ss:$8 sps:$4 sm:$0xff]   ;;  %v1431_v23 = vld [vmem:[#allocation5 + $0x154] ss:$8 sps:$4 sm:$0xff]   ;;  %v1441_v31 = vld [vmem:[#allocation5 + $0x170] ss:$8 sps:$4 sm:$0xff]  }
  0x6f   : > { %v1435_v28 = vld [vmem:[#allocation5 + $0x160] ss:$8 sps:$4 sm:$0xff]   ;;  %v1443_v29 = vld [vmem:[#allocation5 + $0x174] ss:$8 sps:$4 sm:$0xff]   ;;  %v371_v57 = vld [vmem:[%s1774_s2] sm:$0x3] }
  0x70   : > { %892 = vmatpush1.bf16.msra.mxu1 %v1354_v25  ;;  %972 = vmatpush1.bf16.msra.mxu0 %v1402_v37  ;;  %v1429_v25 = vld [vmem:[#allocation5 + $0x150] ss:$8 sps:$4 sm:$0xff]   ;;  %v1447_v33 = vld [vmem:[#allocation5 + $0x180] ss:$8 sps:$4 sm:$0xff]   ;;  %v1455_v34 = vld [vmem:[#allocation5 + $0x194] ss:$8 sps:$4 sm:$0xff]  }
  0x71   : > { %893 = vmatprep.subr.bf16.mxu1 %v1355_v26  ;;  %973 = vmatprep.subr.bf16.mxu0 %v1403_v38  ;;  %v1437_v26 = vld [vmem:[#allocation5 + $0x164] ss:$8 sps:$4 sm:$0xff]   ;;  %v1457_v37 = vld [vmem:[#allocation5 + $0x1a0] ss:$8 sps:$4 sm:$0xff]   ;;  %v1462_v38 = vld [vmem:[#allocation5 + $0x1b4] ss:$8 sps:$4 sm:$0xff]  }
  0x72   : > { %s1160_s30 = sshll.u32 %s1794_s4, 3 }
  0x73   : > { %s257_s10 = scalar_lea.vmem %s1777_s5, %s1160_s30 }
  0x74   : > { %894 = vmatpush1.bf16.msra.mxu1 %v1357_v30  ;;  %974 = vmatpush1.bf16.msra.mxu0 %v1408_v41  ;;  %v272_v30 = vpack.c.bf16 %v265_v27, %v265_v27  ;;  %v1466_v41 = vld [vmem:[#allocation5 + $0x1c0] ss:$8 sps:$4 sm:$0xff]  }
  0x75   : > { %895 = vmatprep.subr.bf16.mxu1 %v1358_v32  ;;  %975 = vmatprep.subr.bf16.mxu0 %v1409_v42  ;;  %v1449_v32 = vld [vmem:[#allocation5 + $0x184] ss:$8 sps:$4 sm:$0xff]   ;;  %v1471_v42 = vld [vmem:[#allocation5 + $0x1d4] ss:$8 sps:$4 sm:$0xff]  }
  0x78   : > { %896 = vmatpush1.bf16.msra.mxu1 %v1360_v35  ;;  %976 = vmatpush1.bf16.msra.mxu0 %v1414_v45  ;;  %v1453_v35 = vld [vmem:[#allocation5 + $0x190] ss:$8 sps:$4 sm:$0xff]   ;;  %v1472_v45 = vld [vmem:[#allocation5 + $0x1e0] ss:$8 sps:$4 sm:$0xff]  }
  0x79   : > { %897 = vmatprep.subr.bf16.mxu1 %v1363_v36  ;;  %977 = vmatprep.subr.bf16.mxu0 %v1415_v46  ;;  %v1459_v36 = vld [vmem:[#allocation5 + $0x1a4] ss:$8 sps:$4 sm:$0xff]   ;;  %v1477_v46 = vld [vmem:[#allocation5 + $0x1f4] ss:$8 sps:$4 sm:$0xff]  }
  0x7c   : > { %898 = vmatpush1.bf16.msra.mxu1 %v1366_v39  ;;  %978 = vmatpush1.bf16.msra.mxu0 %v1420_v49  ;;  %v1460_v39 = vld [vmem:[#allocation5 + $0x1b0] ss:$8 sps:$4 sm:$0xff]  }
  0x7d   : > { %899 = vmatprep.subr.bf16.mxu1 %v1369_v40  ;;  %979 = vmatprep.subr.bf16.mxu0 %v1421_v50  ;;  %v1468_v40 = vld [vmem:[#allocation5 + $0x1c4] ss:$8 sps:$4 sm:$0xff]  }
  0x80   : > { %900 = vmatpush1.bf16.msra.mxu1 %v1372_v43  ;;  %980 = vmatpush1.bf16.msra.mxu0 %v1426_v53  ;;  %v1469_v43 = vld [vmem:[#allocation5 + $0x1d0] ss:$8 sps:$4 sm:$0xff]  }
  0x81   : > { %901 = vmatprep.subr.bf16.mxu1 %v1375_v44  ;;  %981 = vmatprep.subr.bf16.mxu0 %v1427_v54  ;;  %v1474_v44 = vld [vmem:[#allocation5 + $0x1e4] ss:$8 sps:$4 sm:$0xff]   ;;  %v373_v54 = vlaneseq }
  0x84   : > { %902 = vmatpush1.bf16.msra.mxu1 %v1378_v47  ;;  %982 = vmatpush1.bf16.msra.mxu0 %v1432_v58  ;;  %v1475_v47 = vld [vmem:[#allocation5 + $0x1f0] ss:$8 sps:$4 sm:$0xff]  }
  0x85   : > { %903 = vmatprep.subr.bf16.mxu1 %v1381_v48  ;;  %983 = vmatprep.subr.bf16.mxu0 %v1433_v60  ;;  %v261_v48 = vld [vmem:[%s1731_s28 + $0x10] sm:$0xff] }
  0x86   : > { %v268_v49 = vpack.c.bf16 %v261_v48, %v261_v48 }
  0x88   : > { %904 = vmatpush1.bf16.msra.mxu1 %v1384_v51  ;;  %984 = vmatpush1.bf16.msra.mxu0 %v1438_v0 }
  0x89   : > { %905 = vmatprep.subr.bf16.mxu1 %v1387_v52  ;;  %985 = vmatprep.subr.bf16.mxu0 %v1439_v2  ;;  %v1045_v2 = vld [vmem:[%s1775_s3] sm:$0x3] }
  0x8c   : > { %906 = vmatpush1.bf16.msra.mxu1 %v1390_v55  ;;  %986 = vmatpush1.bf16.msra.mxu0 %v1444_v5  ;;  %v374_v55 = vshrl.u32 %v373_v54, 7 }
  0x8d   : > { %907 = vmatprep.subr.bf16.mxu1 %v1393_v56  ;;  %987 = vmatprep.subr.bf16.mxu0 %v1445_v6 }
  0x8e   : > { %v375_v56 = vsub.s32 0, %v374_v55  ;;  %v379_v58 = vsub.s32 1, %v374_v55 }
  0x90   : > { %908 = vmatpush1.bf16.msra.mxu1 %v1396_v61  ;;  %988 = vmatpush1.bf16.msra.mxu0 %v1450_v11  ;;  %v376_v59 = vrot.slane %v371_v57, %v375_v56  ;;  %v380_v60 = vrot.slane %v371_v57, %v379_v58 }
  0x91   : > { %918 = vmatprep.subr.bf16.mxu1 %v1401_v63  ;;  %989 = vmatprep.subr.bf16.mxu0 %v1451_v12 }
  0x93   : > { %910 = vmatmul.mubr.bf16.vlgmr.msra.gmra.mrb[0].mxu1 %v266_v1 }
  0x94   : > { %919 = vmatpush1.bf16.msra.mxu1 %v1399_v3  ;;  %950 = vmatprep.mubr.bf16.mxu1 %v269_v10 }
  0x95   : > { %920 = vmatprep.subr.bf16.mxu1 %v1407_v4  ;;  %990 = vmatpush1.bf16.msra.mxu0 %v1456_v15  ;;  %v1260_v15 = vld [vmem:[#allocation2] ss:$0 sm:$0xff] }
  0x96   : > { %1000 = vmatprep.subr.bf16.mxu0 %v1465_v17 }
  0x98   : > { %921 = vmatpush1.bf16.msra.mxu1 %v1405_v7  ;;  %992 = vmatmul.mubr.bf16.vlgmr.msra.gmra.mrb[0].mxu0 %v270_v20  ;;  %v1050_v7 = vrot.slane %v1045_v2, %v375_v56 }
  0x99   : > { %922 = vmatprep.subr.bf16.mxu1 %v1413_v9  ;;  %1001 = vmatpush1.bf16.msra.mxu0 %v1463_v21  ;;  %v1054_v9 = vrot.slane %v1045_v2, %v379_v58 }
  0x9a   : > { %1032 = vmatprep.mubr.bf16.mxu0 %v1584_v24 }
  0x9c   : > { %923 = vmatpush1.bf16.msra.mxu1 %v1411_v13 }
  0x9d   : > { %924 = vmatprep.subr.bf16.mxu1 %v1419_v14 }
  0xa0   : > { %925 = vmatpush1.bf16.msra.mxu1 %v1417_v18 }
  0xa1   : > { %926 = vmatprep.subr.bf16.mxu1 %v1425_v19 }
  0xa4   : > { %927 = vmatpush1.bf16.msra.mxu1 %v1423_v22  ;;  %1259 = vmatmul.mubr.msk.bf16.vlgmr.msra.gmra.mrb[0].mxu0 %vm873_vm0, %v272_v30 }
  0xa5   : > { %928 = vmatprep.subr.bf16.mxu1 %v1431_v23 }
  0xa8   : > { %929 = vmatpush1.bf16.msra.mxu1 %v1429_v25 }
  0xa9   : > { %930 = vmatprep.subr.bf16.mxu1 %v1437_v26 }
  0xac   : > { %931 = vmatpush1.bf16.msra.mxu1 %v1435_v28 }
  0xad   : > { %932 = vmatprep.subr.bf16.mxu1 %v1443_v29 }
  0xb0   : > { %933 = vmatpush1.bf16.msra.mxu1 %v1441_v31 }
  0xb1   : > { %934 = vmatprep.subr.bf16.mxu1 %v1449_v32 }
  0xb4   : > { %935 = vmatpush1.bf16.msra.mxu1 %v1447_v33 }
  0xb5   : > { %936 = vmatprep.subr.bf16.mxu1 %v1455_v34 }
  0xb8   : > { %937 = vmatpush1.bf16.msra.mxu1 %v1453_v35 }
  0xb9   : > { %938 = vmatprep.subr.bf16.mxu1 %v1459_v36 }
  0xbc   : > { %939 = vmatpush1.bf16.msra.mxu1 %v1457_v37 }
  0xbd   : > { %940 = vmatprep.subr.bf16.mxu1 %v1462_v38 }
  0xc0   : > { %941 = vmatpush1.bf16.msra.mxu1 %v1460_v39 }
  0xc1   : > { %942 = vmatprep.subr.bf16.mxu1 %v1468_v40 }
  0xc4   : > { %943 = vmatpush1.bf16.msra.mxu1 %v1466_v41 }
  0xc5   : > { %944 = vmatprep.subr.bf16.mxu1 %v1471_v42 }
  0xc8   : > { %945 = vmatpush1.bf16.msra.mxu1 %v1469_v43 }
  0xc9   : > { %946 = vmatprep.subr.bf16.mxu1 %v1474_v44 }
  0xcc   : > { %947 = vmatpush1.bf16.msra.mxu1 %v1472_v45 }
  0xcd   : > { %948 = vmatprep.subr.bf16.mxu1 %v1477_v46 }
  0xd0   : > { %949 = vmatpush1.bf16.msra.mxu1 %v1475_v47 }
  0xd3   : > { %951 = vmatmul.mubr.bf16.vlgmr.msra.gmra.mrb[0].mxu1 %v268_v49 }
 0x177   : > { %v1034_v50 = vpop.f32.mrb[0].mxu0 }
 0x178   : > { %v1036_v51 = vpop.f32.mrb[1].mxu0 }
 0x179   : > { %v1038_v52 = vpop.f32.mrb[2].mxu0 }
 0x17a   : > { %v1039_v53 = vpop.f32.mrb[3].mxu0 }
 0x1a6   : > { %v952_v61 = vpop.f32.mrb[0].mxu1 }
 0x1a7   : > { %v1263_v62 = vadd.f32 %v952_v61, %v376_v59  ;;  %v954_v63 = vpop.f32.mrb[1].mxu1 }
 0x1a8   : > { %v1265_v0 = vadd.f32 %v954_v63, %v380_v60  ;;  %v956_v1 = vpop.f32.mrb[2].mxu1 }
 0x1a9   : > { %v1264_v3 = vadd.f32 %v1263_v62, %v1034_v50  ;;  %v957_v4 = vpop.f32.mrb[3].mxu1 }
 0x1aa   : > { %v1266_v5 = vadd.f32 %v1265_v0, %v1036_v51 }
 0x1ab   : > { %v1041_v6 = vmul.f32 0.01, %v1264_v3 }
 0x1ac   : > { %v1042_v8 = vmul.f32 0.01, %v1266_v5 }
 0x1ad   : > { %v1043_v10 = vmax.f32 %v1264_v3, %v1041_v6 }
 0x1ae   : > { %v1044_v11 = vmax.f32 %v1266_v5, %v1042_v8 }
 0x1af   : > { %v1057_v12 = vmul.f32 %v1050_v7, %v1043_v10 }
 0x1b0   : > { %v1058_v13 = vmul.f32 %v1054_v9, %v1044_v11 }
 0x1b2   : > { %v1059_v14 = vadd.f32 %v1058_v13, %v1057_v12 }
 0x1b4   : > { %1060 = vadd.xlane.f32.xlu0 %v1059_v14 }
 0x241   : > { %v1061_v16 = vpop.xlane.xlu0 %1060 }
 0x242   : > { %v1069_v17 = vadd.f32 %v1260_v15, %v1061_v16 }
 0x244   : > { %v1070_v18 = vsub.f32 0.0, %v1069_v17 }
 0x246   : > { %v1071_v19 = vmul.f32 1.442695, %v1070_v18 }
 0x248   : > { %1478 = vpow2.f32 %v1071_v19 }
 0x252   : > { %v1479_v20 = vpop.eup %1478 }
 0x253   : > { %v1073_v21 = vadd.f32 1.0, %v1479_v20 }
 0x255   : > { %1480 = vrcp.f32 %v1073_v21 }
 0x25f   : > { %v1481_v22 = vpop.eup %1480 }
 0x260   : > { %1077 = vst.msk [vmem:[%s257_s10] sm:$0xff] %vm1076_vm1, %v1481_v22 }
 0x261 PF: > { %p18_p8 = scmp.ge.s32.totalorder %s1662_s29, 5   ;;  %s1789_s20 = smov %s1570_s21 }
 0x262   : > { %s1790_s21 = smov %s1574_s22  ;;  %s1791_s22 = smov %s1688_s19 }
 0x263   : > { %s1792_s23 = smov %s1662_s29  ;;  %20 = sbr.rel (!%p18_p8) target bundleno = 7 (0x7), region = 84 }
 0x26a   :  { %1097 = vsyncpa [#allocation4], 1 }
 0x26b   :  { %1099 = vsyncpa [#allocation4 + $0x1], 1 }
 0x26c   :  { %1100 = vsyncpa [#allocation6], 1 }

</bundles_post_ra>
